<compile_context>
chip_gen: v7x
topology: tpu7x:2x2x1
jax: 0.10.0
libtpu: 0.0.40
codegen_flags: <defaults>
</compile_context>

<pallas_src>
import functools

import jax
import jax.numpy as jnp
from jax import lax
from jax.experimental import pallas as pl
from jax.experimental.pallas import tpu as pltpu


def _gather_kernel(idx_ref, x_hbm, o_ref, sems, *, num_prefix, num_keep, ring):
    """Per-batch-row gather of kept tokens via manual DMA.

    idx_ref : SMEM int32[(B*num_keep,)]   flattened keep indices (scalar prefetch)
    x_hbm   : HBM  ref (B, L, D)          raw input, manual DMA source
    o_ref   : VMEM ref (1, num_out, D)    contiguous output block for this row
    sems    : DMA semaphores, shape (ring + 1,); slot `ring` is for the prefix.
    """
    P = num_prefix
    b = pl.program_id(0)

    def gather_start(t, slot):
        src = P + idx_ref[b * num_keep + t]
        pltpu.make_async_copy(
            x_hbm.at[pl.ds(b, 1), pl.ds(src, 1), :],
            o_ref.at[:, pl.ds(P + t, 1), :],
            sems.at[slot],
        ).start()

    def gather_wait(slot):
        # Dummy same-shape descriptor: the wait only needs the semaphore and the
        # transfer size (every gather copy moves one (1, 1, D) token row).
        pltpu.make_async_copy(
            x_hbm.at[pl.ds(b, 1), pl.ds(0, 1), :],
            o_ref.at[:, pl.ds(0, 1), :],
            sems.at[slot],
        ).wait()

    # 1) Prefix tokens: one bulk contiguous DMA x[b, :P, :] -> out[b, :P, :].
    if P > 0:
        pltpu.make_async_copy(
            x_hbm.at[pl.ds(b, 1), pl.ds(0, P), :],
            o_ref.at[:, pl.ds(0, P), :],
            sems.at[ring],
        ).start()

    # 2) Gather kept patch tokens, keeping up to `ring` DMAs in flight.
    n_live = min(ring, num_keep)

    # Prologue: fill the ring (static unroll; ring is small).
    for t in range(n_live):
        gather_start(t, t)

    # Steady state: free a slot, then reuse it for the next token.
    def body(t, carry):
        slot = t % ring
        gather_wait(slot)
        gather_start(t, slot)
        return carry

    lax.fori_loop(n_live, num_keep, body, 0)

    # 3) Drain all in-flight DMAs before the output block is written back.
    for slot in range(n_live):
        gather_wait(slot)
    if P > 0:
        pltpu.make_async_copy(
            x_hbm.at[pl.ds(b, 1), pl.ds(0, P), :],
            o_ref.at[:, pl.ds(0, P), :],
            sems.at[ring],
        ).wait()


def patch_dropout_with_indices(
    x: jax.Array,
    key: jax.Array,
    prob: float = 0.5,
    num_prefix_tokens: int = 1,
    ordered: bool = False,
    training: bool = True,
    ring: int = 8,
):
    """JAX/Pallas equivalent of timm PatchDropoutWithIndices.forward."""
    if not training or prob == 0.0:
        return x, None

    B, L, D = x.shape
    P = num_prefix_tokens
    L_patch = L - P
    num_keep = max(1, int(L_patch * (1.0 - prob)))
    num_out = P + num_keep
    itemsize = jnp.dtype(x.dtype).itemsize

    # --- random keep-index generation (plain-JAX glue; no Pallas argsort) ---
    # TODO(synk): torch.randn/argsort RNG stream cannot be bit-matched; use JAX RNG.
    noise = jax.random.normal(key, (B, L_patch), dtype=jnp.float32)
    # indices of the num_keep smallest noise values == argsort(noise)[:, :num_keep],
    # but top_k(k=num_keep) is cheaper than a full argsort over L_patch.
    _, keep_indices = jax.lax.top_k(-noise, num_keep)
    if ordered:
        keep_indices = jnp.sort(keep_indices, axis=-1)
    keep_indices = keep_indices.astype(jnp.int32)

    # --- Pallas gather kernel ---
    ring = max(1, min(ring, num_keep))
    out_block_bytes = num_out * D * itemsize
    # Double-buffered output block must fit; stay well under v7x's 64 MiB VMEM.
    vmem_limit = int(min(64 * 1024 * 1024,
                         max(16 * 1024 * 1024, 4 * out_block_bytes)))

    kernel = functools.partial(
        _gather_kernel, num_prefix=P, num_keep=num_keep, ring=ring)

    out = pl.pallas_call(
        kernel,
        out_shape=jax.ShapeDtypeStruct((B, num_out, D), x.dtype),
        grid_spec=pltpu.PrefetchScalarGridSpec(
            num_scalar_prefetch=1,
            grid=(B,),
            in_specs=[pl.BlockSpec(memory_space=pl.ANY)],
            out_specs=pl.BlockSpec((1, num_out, D), lambda b, idx: (b, 0, 0)),
            scratch_shapes=[pltpu.SemaphoreType.DMA((ring + 1,))],
        ),
        compiler_params=pltpu.CompilerParams(
            dimension_semantics=("parallel",),   # rows independent; 2x on v7x
            vmem_limit_bytes=vmem_limit,
        ),
        cost_estimate=pl.CostEstimate(
            flops=0,
            transcendentals=0,
            bytes_accessed=2 * B * num_out * D * itemsize,
        ),
    )(keep_indices.reshape(-1), x)

    return out, keep_indices


def _reference(x, keep_indices, num_prefix_tokens):
    """Plain-JAX reference mirroring the PyTorch gather semantics."""
    P = num_prefix_tokens
    prefix, patches = x[:, :P], x[:, P:]
    gathered = jnp.take_along_axis(patches, keep_indices[..., None], axis=1)
    return jnp.concatenate([prefix, gathered], axis=1)


if __name__ == "__main__":
    key = jax.random.PRNGKey(0)
    k_x, k_drop = jax.random.split(key)
    # Small deterministic example: B=2, L=17 (1 prefix + 16 patches), D=128
    # (lane-dense hidden dim).
    B, L, D = 2, 17, 128
    x = jax.random.normal(k_x, (B, L, D), dtype=jnp.float32)

    # Case 1: default timm config (prob=0.5, one prefix token, unordered).
    out, keep_indices = patch_dropout_with_indices(
        x, k_drop, prob=0.5, num_prefix_tokens=1, ordered=False, training=True)
    out = jax.block_until_ready(out)
    keep_indices = jax.block_until_ready(keep_indices)
    ref = _reference(x, keep_indices, 1)
    assert out.shape == ref.shape, (out.shape, ref.shape)
    assert jnp.array_equal(out, ref), "Pallas gather mismatch vs reference (case 1)"

    # Case 2: no prefix tokens, ordered=True (exercises the steady-state DMA loop).
    out2, idx2 = patch_dropout_with_indices(
        x, k_drop, prob=0.25, num_prefix_tokens=0, ordered=True, training=True)
    out2 = jax.block_until_ready(out2)
    ref2 = _reference(x, idx2, 0)
    assert jnp.array_equal(out2, ref2), "Pallas gather mismatch vs reference (case 2)"
    assert bool(jnp.all(idx2[:, 1:] >= idx2[:, :-1])), "ordered indices not sorted"

    # Eval / prob==0 path returns input unchanged and None indices.
    out_eval, idx_eval = patch_dropout_with_indices(
        x, k_drop, prob=0.5, num_prefix_tokens=1, ordered=False, training=False)
    assert idx_eval is None and out_eval is x

    print("KERNEL_OK")
</pallas_src>

<mosaic_0001>
module attributes {stable_mosaic.version = 11 : i64} {
  func.func @_gather_kernel(%arg0: i32, %arg1: memref<16xi32, #tpu.memory_space<smem>>, %arg2: memref<2x17x128xf32, #tpu.memory_space<any>>, %arg3: memref<1x9x128xf32, #tpu.memory_space<vmem>>, %arg4: memref<9x!tpu.dma_semaphore, #tpu.memory_space<semaphore_mem>>) attributes {dimension_semantics = [#tpu.dimension_semantics<parallel>], iteration_bounds = array<i64: 2>, scalar_prefetch = 1 : i64, scratch_operands = 1 : i64, tpu.core_type = #tpu.core_type<tc>, window_params = [{}, {transform_indices = @transform_1, window_bounds = array<i64: 1, 9, 128>}]} {
    %c8_i32 = arith.constant 8 : i32
    %c0_i32 = arith.constant 0 : i32
    %c0_i32_0 = arith.constant 0 : i32
    %0 = tpu.memref_slice %arg2[%arg0, %c0_i32, %c0_i32_0] : memref<2x17x128xf32, #tpu.memory_space<any>> -> memref<1x1x128xf32, #tpu.memory_space<any>>
    %c0_i32_1 = arith.constant 0 : i32
    %c0_i32_2 = arith.constant 0 : i32
    %c0_i32_3 = arith.constant 0 : i32
    %1 = tpu.memref_slice %arg3[%c0_i32_1, %c0_i32_2, %c0_i32_3] : memref<1x9x128xf32, #tpu.memory_space<vmem>> -> memref<1x1x128xf32, #tpu.memory_space<vmem>>
    %2 = tpu.memref_slice %arg4[%c8_i32] : memref<9x!tpu.dma_semaphore, #tpu.memory_space<semaphore_mem>> -> memref<1x!tpu.dma_semaphore, #tpu.memory_space<semaphore_mem>>
    %3 = tpu.memref_squeeze %2 : memref<1x!tpu.dma_semaphore, #tpu.memory_space<semaphore_mem>> -> memref<!tpu.dma_semaphore, #tpu.memory_space<semaphore_mem>>
    tpu.enqueue_dma source(%0 : memref<1x1x128xf32, #tpu.memory_space<any>>) target(%1 : memref<1x1x128xf32, #tpu.memory_space<vmem>>) target_semaphore(%3 : memref<!tpu.dma_semaphore, #tpu.memory_space<semaphore_mem>>)
    %c8_i32_4 = arith.constant 8 : i32
    %4 = arith.muli %arg0, %c8_i32_4 : i32
    %c0_i32_5 = arith.constant 0 : i32
    %5 = arith.addi %4, %c0_i32_5 : i32
    %6 = arith.index_cast %5 : i32 to index
    %7 = memref.load %arg1[%6] : memref<16xi32, #tpu.memory_space<smem>>
    %c1_i32 = arith.constant 1 : i32
    %8 = arith.addi %c1_i32, %7 : i32
    %c0_i32_6 = arith.constant 0 : i32
    %c0_i32_7 = arith.constant 0 : i32
    %9 = tpu.memref_slice %arg2[%arg0, %8, %c0_i32_7] : memref<2x17x128xf32, #tpu.memory_space<any>> -> memref<1x1x128xf32, #tpu.memory_space<any>>
    %c0_i32_8 = arith.constant 0 : i32
    %c1_i32_9 = arith.constant 1 : i32
    %c0_i32_10 = arith.constant 0 : i32
    %10 = tpu.memref_slice %arg3[%c0_i32_8, %c1_i32_9, %c0_i32_10] : memref<1x9x128xf32, #tpu.memory_space<vmem>> -> memref<1x1x128xf32, #tpu.memory_space<vmem>>
    %11 = tpu.memref_slice %arg4[%c0_i32_6] : memref<9x!tpu.dma_semaphore, #tpu.memory_space<semaphore_mem>> -> memref<1x!tpu.dma_semaphore, #tpu.memory_space<semaphore_mem>>
    %12 = tpu.memref_squeeze %11 : memref<1x!tpu.dma_semaphore, #tpu.memory_space<semaphore_mem>> -> memref<!tpu.dma_semaphore, #tpu.memory_space<semaphore_mem>>
    tpu.enqueue_dma source(%9 : memref<1x1x128xf32, #tpu.memory_space<any>>) target(%10 : memref<1x1x128xf32, #tpu.memory_space<vmem>>) target_semaphore(%12 : memref<!tpu.dma_semaphore, #tpu.memory_space<semaphore_mem>>)
    %c8_i32_11 = arith.constant 8 : i32
    %13 = arith.muli %arg0, %c8_i32_11 : i32
    %c1_i32_12 = arith.constant 1 : i32
    %14 = arith.addi %13, %c1_i32_12 : i32
    %15 = arith.index_cast %14 : i32 to index
    %16 = memref.load %arg1[%15] : memref<16xi32, #tpu.memory_space<smem>>
    %c1_i32_13 = arith.constant 1 : i32
    %17 = arith.addi %c1_i32_13, %16 : i32
    %c1_i32_14 = arith.constant 1 : i32
    %c0_i32_15 = arith.constant 0 : i32
    %18 = tpu.memref_slice %arg2[%arg0, %17, %c0_i32_15] : memref<2x17x128xf32, #tpu.memory_space<any>> -> memref<1x1x128xf32, #tpu.memory_space<any>>
    %c0_i32_16 = arith.constant 0 : i32
    %c2_i32 = arith.constant 2 : i32
    %c0_i32_17 = arith.constant 0 : i32
    %19 = tpu.memref_slice %arg3[%c0_i32_16, %c2_i32, %c0_i32_17] : memref<1x9x128xf32, #tpu.memory_space<vmem>> -> memref<1x1x128xf32, #tpu.memory_space<vmem>>
    %20 = tpu.memref_slice %arg4[%c1_i32_14] : memref<9x!tpu.dma_semaphore, #tpu.memory_space<semaphore_mem>> -> memref<1x!tpu.dma_semaphore, #tpu.memory_space<semaphore_mem>>
    %21 = tpu.memref_squeeze %20 : memref<1x!tpu.dma_semaphore, #tpu.memory_space<semaphore_mem>> -> memref<!tpu.dma_semaphore, #tpu.memory_space<semaphore_mem>>
    tpu.enqueue_dma source(%18 : memref<1x1x128xf32, #tpu.memory_space<any>>) target(%19 : memref<1x1x128xf32, #tpu.memory_space<vmem>>) target_semaphore(%21 : memref<!tpu.dma_semaphore, #tpu.memory_space<semaphore_mem>>)
    %c8_i32_18 = arith.constant 8 : i32
    %22 = arith.muli %arg0, %c8_i32_18 : i32
    %c2_i32_19 = arith.constant 2 : i32
    %23 = arith.addi %22, %c2_i32_19 : i32
    %24 = arith.index_cast %23 : i32 to index
    %25 = memref.load %arg1[%24] : memref<16xi32, #tpu.memory_space<smem>>
    %c1_i32_20 = arith.constant 1 : i32
    %26 = arith.addi %c1_i32_20, %25 : i32
    %c2_i32_21 = arith.constant 2 : i32
    %c0_i32_22 = arith.constant 0 : i32
    %27 = tpu.memref_slice %arg2[%arg0, %26, %c0_i32_22] : memref<2x17x128xf32, #tpu.memory_space<any>> -> memref<1x1x128xf32, #tpu.memory_space<any>>
    %c0_i32_23 = arith.constant 0 : i32
    %c3_i32 = arith.constant 3 : i32
    %c0_i32_24 = arith.constant 0 : i32
    %28 = tpu.memref_slice %arg3[%c0_i32_23, %c3_i32, %c0_i32_24] : memref<1x9x128xf32, #tpu.memory_space<vmem>> -> memref<1x1x128xf32, #tpu.memory_space<vmem>>
    %29 = tpu.memref_slice %arg4[%c2_i32_21] : memref<9x!tpu.dma_semaphore, #tpu.memory_space<semaphore_mem>> -> memref<1x!tpu.dma_semaphore, #tpu.memory_space<semaphore_mem>>
    %30 = tpu.memref_squeeze %29 : memref<1x!tpu.dma_semaphore, #tpu.memory_space<semaphore_mem>> -> memref<!tpu.dma_semaphore, #tpu.memory_space<semaphore_mem>>
    tpu.enqueue_dma source(%27 : memref<1x1x128xf32, #tpu.memory_space<any>>) target(%28 : memref<1x1x128xf32, #tpu.memory_space<vmem>>) target_semaphore(%30 : memref<!tpu.dma_semaphore, #tpu.memory_space<semaphore_mem>>)
    %c8_i32_25 = arith.constant 8 : i32
    %31 = arith.muli %arg0, %c8_i32_25 : i32
    %c3_i32_26 = arith.constant 3 : i32
    %32 = arith.addi %31, %c3_i32_26 : i32
    %33 = arith.index_cast %32 : i32 to index
    %34 = memref.load %arg1[%33] : memref<16xi32, #tpu.memory_space<smem>>
    %c1_i32_27 = arith.constant 1 : i32
    %35 = arith.addi %c1_i32_27, %34 : i32
    %c3_i32_28 = arith.constant 3 : i32
    %c0_i32_29 = arith.constant 0 : i32
    %36 = tpu.memref_slice %arg2[%arg0, %35, %c0_i32_29] : memref<2x17x128xf32, #tpu.memory_space<any>> -> memref<1x1x128xf32, #tpu.memory_space<any>>
    %c0_i32_30 = arith.constant 0 : i32
    %c4_i32 = arith.constant 4 : i32
    %c0_i32_31 = arith.constant 0 : i32
    %37 = tpu.memref_slice %arg3[%c0_i32_30, %c4_i32, %c0_i32_31] : memref<1x9x128xf32, #tpu.memory_space<vmem>> -> memref<1x1x128xf32, #tpu.memory_space<vmem>>
    %38 = tpu.memref_slice %arg4[%c3_i32_28] : memref<9x!tpu.dma_semaphore, #tpu.memory_space<semaphore_mem>> -> memref<1x!tpu.dma_semaphore, #tpu.memory_space<semaphore_mem>>
    %39 = tpu.memref_squeeze %38 : memref<1x!tpu.dma_semaphore, #tpu.memory_space<semaphore_mem>> -> memref<!tpu.dma_semaphore, #tpu.memory_space<semaphore_mem>>
    tpu.enqueue_dma source(%36 : memref<1x1x128xf32, #tpu.memory_space<any>>) target(%37 : memref<1x1x128xf32, #tpu.memory_space<vmem>>) target_semaphore(%39 : memref<!tpu.dma_semaphore, #tpu.memory_space<semaphore_mem>>)
    %c8_i32_32 = arith.constant 8 : i32
    %40 = arith.muli %arg0, %c8_i32_32 : i32
    %c4_i32_33 = arith.constant 4 : i32
    %41 = arith.addi %40, %c4_i32_33 : i32
    %42 = arith.index_cast %41 : i32 to index
    %43 = memref.load %arg1[%42] : memref<16xi32, #tpu.memory_space<smem>>
    %c1_i32_34 = arith.constant 1 : i32
    %44 = arith.addi %c1_i32_34, %43 : i32
    %c4_i32_35 = arith.constant 4 : i32
    %c0_i32_36 = arith.constant 0 : i32
    %45 = tpu.memref_slice %arg2[%arg0, %44, %c0_i32_36] : memref<2x17x128xf32, #tpu.memory_space<any>> -> memref<1x1x128xf32, #tpu.memory_space<any>>
    %c0_i32_37 = arith.constant 0 : i32
    %c5_i32 = arith.constant 5 : i32
    %c0_i32_38 = arith.constant 0 : i32
    %46 = tpu.memref_slice %arg3[%c0_i32_37, %c5_i32, %c0_i32_38] : memref<1x9x128xf32, #tpu.memory_space<vmem>> -> memref<1x1x128xf32, #tpu.memory_space<vmem>>
    %47 = tpu.memref_slice %arg4[%c4_i32_35] : memref<9x!tpu.dma_semaphore, #tpu.memory_space<semaphore_mem>> -> memref<1x!tpu.dma_semaphore, #tpu.memory_space<semaphore_mem>>
    %48 = tpu.memref_squeeze %47 : memref<1x!tpu.dma_semaphore, #tpu.memory_space<semaphore_mem>> -> memref<!tpu.dma_semaphore, #tpu.memory_space<semaphore_mem>>
    tpu.enqueue_dma source(%45 : memref<1x1x128xf32, #tpu.memory_space<any>>) target(%46 : memref<1x1x128xf32, #tpu.memory_space<vmem>>) target_semaphore(%48 : memref<!tpu.dma_semaphore, #tpu.memory_space<semaphore_mem>>)
    %c8_i32_39 = arith.constant 8 : i32
    %49 = arith.muli %arg0, %c8_i32_39 : i32
    %c5_i32_40 = arith.constant 5 : i32
    %50 = arith.addi %49, %c5_i32_40 : i32
    %51 = arith.index_cast %50 : i32 to index
    %52 = memref.load %arg1[%51] : memref<16xi32, #tpu.memory_space<smem>>
    %c1_i32_41 = arith.constant 1 : i32
    %53 = arith.addi %c1_i32_41, %52 : i32
    %c5_i32_42 = arith.constant 5 : i32
    %c0_i32_43 = arith.constant 0 : i32
    %54 = tpu.memref_slice %arg2[%arg0, %53, %c0_i32_43] : memref<2x17x128xf32, #tpu.memory_space<any>> -> memref<1x1x128xf32, #tpu.memory_space<any>>
    %c0_i32_44 = arith.constant 0 : i32
    %c6_i32 = arith.constant 6 : i32
    %c0_i32_45 = arith.constant 0 : i32
    %55 = tpu.memref_slice %arg3[%c0_i32_44, %c6_i32, %c0_i32_45] : memref<1x9x128xf32, #tpu.memory_space<vmem>> -> memref<1x1x128xf32, #tpu.memory_space<vmem>>
    %56 = tpu.memref_slice %arg4[%c5_i32_42] : memref<9x!tpu.dma_semaphore, #tpu.memory_space<semaphore_mem>> -> memref<1x!tpu.dma_semaphore, #tpu.memory_space<semaphore_mem>>
    %57 = tpu.memref_squeeze %56 : memref<1x!tpu.dma_semaphore, #tpu.memory_space<semaphore_mem>> -> memref<!tpu.dma_semaphore, #tpu.memory_space<semaphore_mem>>
    tpu.enqueue_dma source(%54 : memref<1x1x128xf32, #tpu.memory_space<any>>) target(%55 : memref<1x1x128xf32, #tpu.memory_space<vmem>>) target_semaphore(%57 : memref<!tpu.dma_semaphore, #tpu.memory_space<semaphore_mem>>)
    %c8_i32_46 = arith.constant 8 : i32
    %58 = arith.muli %arg0, %c8_i32_46 : i32
    %c6_i32_47 = arith.constant 6 : i32
    %59 = arith.addi %58, %c6_i32_47 : i32
    %60 = arith.index_cast %59 : i32 to index
    %61 = memref.load %arg1[%60] : memref<16xi32, #tpu.memory_space<smem>>
    %c1_i32_48 = arith.constant 1 : i32
    %62 = arith.addi %c1_i32_48, %61 : i32
    %c6_i32_49 = arith.constant 6 : i32
    %c0_i32_50 = arith.constant 0 : i32
    %63 = tpu.memref_slice %arg2[%arg0, %62, %c0_i32_50] : memref<2x17x128xf32, #tpu.memory_space<any>> -> memref<1x1x128xf32, #tpu.memory_space<any>>
    %c0_i32_51 = arith.constant 0 : i32
    %c7_i32 = arith.constant 7 : i32
    %c0_i32_52 = arith.constant 0 : i32
    %64 = tpu.memref_slice %arg3[%c0_i32_51, %c7_i32, %c0_i32_52] : memref<1x9x128xf32, #tpu.memory_space<vmem>> -> memref<1x1x128xf32, #tpu.memory_space<vmem>>
    %65 = tpu.memref_slice %arg4[%c6_i32_49] : memref<9x!tpu.dma_semaphore, #tpu.memory_space<semaphore_mem>> -> memref<1x!tpu.dma_semaphore, #tpu.memory_space<semaphore_mem>>
    %66 = tpu.memref_squeeze %65 : memref<1x!tpu.dma_semaphore, #tpu.memory_space<semaphore_mem>> -> memref<!tpu.dma_semaphore, #tpu.memory_space<semaphore_mem>>
    tpu.enqueue_dma source(%63 : memref<1x1x128xf32, #tpu.memory_space<any>>) target(%64 : memref<1x1x128xf32, #tpu.memory_space<vmem>>) target_semaphore(%66 : memref<!tpu.dma_semaphore, #tpu.memory_space<semaphore_mem>>)
    %c8_i32_53 = arith.constant 8 : i32
    %67 = arith.muli %arg0, %c8_i32_53 : i32
    %c7_i32_54 = arith.constant 7 : i32
    %68 = arith.addi %67, %c7_i32_54 : i32
    %69 = arith.index_cast %68 : i32 to index
    %70 = memref.load %arg1[%69] : memref<16xi32, #tpu.memory_space<smem>>
    %c1_i32_55 = arith.constant 1 : i32
    %71 = arith.addi %c1_i32_55, %70 : i32
    %c7_i32_56 = arith.constant 7 : i32
    %c0_i32_57 = arith.constant 0 : i32
    %72 = tpu.memref_slice %arg2[%arg0, %71, %c0_i32_57] : memref<2x17x128xf32, #tpu.memory_space<any>> -> memref<1x1x128xf32, #tpu.memory_space<any>>
    %c0_i32_58 = arith.constant 0 : i32
    %c8_i32_59 = arith.constant 8 : i32
    %c0_i32_60 = arith.constant 0 : i32
    %73 = tpu.memref_slice %arg3[%c0_i32_58, %c8_i32_59, %c0_i32_60] : memref<1x9x128xf32, #tpu.memory_space<vmem>> -> memref<1x1x128xf32, #tpu.memory_space<vmem>>
    %74 = tpu.memref_slice %arg4[%c7_i32_56] : memref<9x!tpu.dma_semaphore, #tpu.memory_space<semaphore_mem>> -> memref<1x!tpu.dma_semaphore, #tpu.memory_space<semaphore_mem>>
    %75 = tpu.memref_squeeze %74 : memref<1x!tpu.dma_semaphore, #tpu.memory_space<semaphore_mem>> -> memref<!tpu.dma_semaphore, #tpu.memory_space<semaphore_mem>>
    tpu.enqueue_dma source(%72 : memref<1x1x128xf32, #tpu.memory_space<any>>) target(%73 : memref<1x1x128xf32, #tpu.memory_space<vmem>>) target_semaphore(%75 : memref<!tpu.dma_semaphore, #tpu.memory_space<semaphore_mem>>)
    %c8_i32_61 = arith.constant 8 : i32
    %c0_i32_62 = arith.constant 0 : i32
    %76 = arith.addi %c8_i32_61, %c0_i32_62 : i32
    %c1_i32_63 = arith.constant 1 : i32
    scf.for %arg5 = %c8_i32_61 to %76 step %c1_i32_63  : i32 {
      %c8_i32_119 = arith.constant 8 : i32
      %c0_i32_120 = arith.constant 0 : i32
      %113 = arith.cmpi eq, %c8_i32_119, %c0_i32_120 : i32
      %c1_i32_121 = arith.constant 1 : i32
      %114 = arith.select %113, %c1_i32_121, %c8_i32_119 : i32
      %115 = arith.remsi %arg5, %114 : i32
      %c0_i32_122 = arith.constant 0 : i32
      %116 = arith.cmpi ne, %115, %c0_i32_122 : i32
      %c0_i32_123 = arith.constant 0 : i32
      %117 = arith.cmpi slt, %115, %c0_i32_123 : i32
      %c0_i32_124 = arith.constant 0 : i32
      %118 = arith.cmpi slt, %114, %c0_i32_124 : i32
      %119 = arith.xori %117, %118 : i1
      %120 = arith.andi %119, %116 : i1
      %121 = arith.addi %115, %114 : i32
      %122 = arith.select %120, %121, %115 : i32
      %c0_i32_125 = arith.constant 0 : i32
      %c0_i32_126 = arith.constant 0 : i32
      %123 = tpu.memref_slice %arg2[%arg0, %c0_i32_125, %c0_i32_126] : memref<2x17x128xf32, #tpu.memory_space<any>> -> memref<1x1x128xf32, #tpu.memory_space<any>>
      %c0_i32_127 = arith.constant 0 : i32
      %c0_i32_128 = arith.constant 0 : i32
      %c0_i32_129 = arith.constant 0 : i32
      %124 = tpu.memref_slice %arg3[%c0_i32_127, %c0_i32_128, %c0_i32_129] : memref<1x9x128xf32, #tpu.memory_space<vmem>> -> memref<1x1x128xf32, #tpu.memory_space<vmem>>
      %125 = tpu.memref_slice %arg4[%122] : memref<9x!tpu.dma_semaphore, #tpu.memory_space<semaphore_mem>> -> memref<1x!tpu.dma_semaphore, #tpu.memory_space<semaphore_mem>>
      %126 = tpu.memref_squeeze %125 : memref<1x!tpu.dma_semaphore, #tpu.memory_space<semaphore_mem>> -> memref<!tpu.dma_semaphore, #tpu.memory_space<semaphore_mem>>
      tpu.wait_dma2 semaphore(%126 : memref<!tpu.dma_semaphore, #tpu.memory_space<semaphore_mem>>) src(%123 : memref<1x1x128xf32, #tpu.memory_space<any>>) dst(%124 : memref<1x1x128xf32, #tpu.memory_space<vmem>>)
      %c8_i32_130 = arith.constant 8 : i32
      %127 = arith.muli %arg0, %c8_i32_130 : i32
      %128 = arith.addi %127, %arg5 : i32
      %129 = arith.index_cast %128 : i32 to index
      %130 = memref.load %arg1[%129] : memref<16xi32, #tpu.memory_space<smem>>
      %c1_i32_131 = arith.constant 1 : i32
      %131 = arith.addi %c1_i32_131, %130 : i32
      %c1_i32_132 = arith.constant 1 : i32
      %132 = arith.addi %c1_i32_132, %arg5 : i32
      %c0_i32_133 = arith.constant 0 : i32
      %133 = tpu.memref_slice %arg2[%arg0, %131, %c0_i32_133] : memref<2x17x128xf32, #tpu.memory_space<any>> -> memref<1x1x128xf32, #tpu.memory_space<any>>
      %c0_i32_134 = arith.constant 0 : i32
      %c0_i32_135 = arith.constant 0 : i32
      %134 = tpu.memref_slice %arg3[%c0_i32_134, %132, %c0_i32_135] : memref<1x9x128xf32, #tpu.memory_space<vmem>> -> memref<1x1x128xf32, #tpu.memory_space<vmem>>
      %135 = tpu.memref_slice %arg4[%122] : memref<9x!tpu.dma_semaphore, #tpu.memory_space<semaphore_mem>> -> memref<1x!tpu.dma_semaphore, #tpu.memory_space<semaphore_mem>>
      %136 = tpu.memref_squeeze %135 : memref<1x!tpu.dma_semaphore, #tpu.memory_space<semaphore_mem>> -> memref<!tpu.dma_semaphore, #tpu.memory_space<semaphore_mem>>
      tpu.enqueue_dma source(%133 : memref<1x1x128xf32, #tpu.memory_space<any>>) target(%134 : memref<1x1x128xf32, #tpu.memory_space<vmem>>) target_semaphore(%136 : memref<!tpu.dma_semaphore, #tpu.memory_space<semaphore_mem>>)
    }
    %c0_i32_64 = arith.constant 0 : i32
    %c0_i32_65 = arith.constant 0 : i32
    %c0_i32_66 = arith.constant 0 : i32
    %c0_i32_67 = arith.constant 0 : i32
    %77 = tpu.memref_slice %arg2[%arg0, %c0_i32_66, %c0_i32_67] : memref<2x17x128xf32, #tpu.memory_space<any>> -> memref<1x1x128xf32, #tpu.memory_space<any>>
    %c0_i32_68 = arith.constant 0 : i32
    %c0_i32_69 = arith.constant 0 : i32
    %c0_i32_70 = arith.constant 0 : i32
    %78 = tpu.memref_slice %arg3[%c0_i32_68, %c0_i32_69, %c0_i32_70] : memref<1x9x128xf32, #tpu.memory_space<vmem>> -> memref<1x1x128xf32, #tpu.memory_space<vmem>>
    %79 = tpu.memref_slice %arg4[%c0_i32_65] : memref<9x!tpu.dma_semaphore, #tpu.memory_space<semaphore_mem>> -> memref<1x!tpu.dma_semaphore, #tpu.memory_space<semaphore_mem>>
    %80 = tpu.memref_squeeze %79 : memref<1x!tpu.dma_semaphore, #tpu.memory_space<semaphore_mem>> -> memref<!tpu.dma_semaphore, #tpu.memory_space<semaphore_mem>>
    tpu.wait_dma2 semaphore(%80 : memref<!tpu.dma_semaphore, #tpu.memory_space<semaphore_mem>>) src(%77 : memref<1x1x128xf32, #tpu.memory_space<any>>) dst(%78 : memref<1x1x128xf32, #tpu.memory_space<vmem>>)
    %c1_i32_71 = arith.constant 1 : i32
    %c0_i32_72 = arith.constant 0 : i32
    %c0_i32_73 = arith.constant 0 : i32
    %81 = tpu.memref_slice %arg2[%arg0, %c0_i32_72, %c0_i32_73] : memref<2x17x128xf32, #tpu.memory_space<any>> -> memref<1x1x128xf32, #tpu.memory_space<any>>
    %c0_i32_74 = arith.constant 0 : i32
    %c0_i32_75 = arith.constant 0 : i32
    %c0_i32_76 = arith.constant 0 : i32
    %82 = tpu.memref_slice %arg3[%c0_i32_74, %c0_i32_75, %c0_i32_76] : memref<1x9x128xf32, #tpu.memory_space<vmem>> -> memref<1x1x128xf32, #tpu.memory_space<vmem>>
    %83 = tpu.memref_slice %arg4[%c1_i32_71] : memref<9x!tpu.dma_semaphore, #tpu.memory_space<semaphore_mem>> -> memref<1x!tpu.dma_semaphore, #tpu.memory_space<semaphore_mem>>
    %84 = tpu.memref_squeeze %83 : memref<1x!tpu.dma_semaphore, #tpu.memory_space<semaphore_mem>> -> memref<!tpu.dma_semaphore, #tpu.memory_space<semaphore_mem>>
    tpu.wait_dma2 semaphore(%84 : memref<!tpu.dma_semaphore, #tpu.memory_space<semaphore_mem>>) src(%81 : memref<1x1x128xf32, #tpu.memory_space<any>>) dst(%82 : memref<1x1x128xf32, #tpu.memory_space<vmem>>)
    %c2_i32_77 = arith.constant 2 : i32
    %c0_i32_78 = arith.constant 0 : i32
    %c0_i32_79 = arith.constant 0 : i32
    %85 = tpu.memref_slice %arg2[%arg0, %c0_i32_78, %c0_i32_79] : memref<2x17x128xf32, #tpu.memory_space<any>> -> memref<1x1x128xf32, #tpu.memory_space<any>>
    %c0_i32_80 = arith.constant 0 : i32
    %c0_i32_81 = arith.constant 0 : i32
    %c0_i32_82 = arith.constant 0 : i32
    %86 = tpu.memref_slice %arg3[%c0_i32_80, %c0_i32_81, %c0_i32_82] : memref<1x9x128xf32, #tpu.memory_space<vmem>> -> memref<1x1x128xf32, #tpu.memory_space<vmem>>
    %87 = tpu.memref_slice %arg4[%c2_i32_77] : memref<9x!tpu.dma_semaphore, #tpu.memory_space<semaphore_mem>> -> memref<1x!tpu.dma_semaphore, #tpu.memory_space<semaphore_mem>>
    %88 = tpu.memref_squeeze %87 : memref<1x!tpu.dma_semaphore, #tpu.memory_space<semaphore_mem>> -> memref<!tpu.dma_semaphore, #tpu.memory_space<semaphore_mem>>
    tpu.wait_dma2 semaphore(%88 : memref<!tpu.dma_semaphore, #tpu.memory_space<semaphore_mem>>) src(%85 : memref<1x1x128xf32, #tpu.memory_space<any>>) dst(%86 : memref<1x1x128xf32, #tpu.memory_space<vmem>>)
    %c3_i32_83 = arith.constant 3 : i32
    %c0_i32_84 = arith.constant 0 : i32
    %c0_i32_85 = arith.constant 0 : i32
    %89 = tpu.memref_slice %arg2[%arg0, %c0_i32_84, %c0_i32_85] : memref<2x17x128xf32, #tpu.memory_space<any>> -> memref<1x1x128xf32, #tpu.memory_space<any>>
    %c0_i32_86 = arith.constant 0 : i32
    %c0_i32_87 = arith.constant 0 : i32
    %c0_i32_88 = arith.constant 0 : i32
    %90 = tpu.memref_slice %arg3[%c0_i32_86, %c0_i32_87, %c0_i32_88] : memref<1x9x128xf32, #tpu.memory_space<vmem>> -> memref<1x1x128xf32, #tpu.memory_space<vmem>>
    %91 = tpu.memref_slice %arg4[%c3_i32_83] : memref<9x!tpu.dma_semaphore, #tpu.memory_space<semaphore_mem>> -> memref<1x!tpu.dma_semaphore, #tpu.memory_space<semaphore_mem>>
    %92 = tpu.memref_squeeze %91 : memref<1x!tpu.dma_semaphore, #tpu.memory_space<semaphore_mem>> -> memref<!tpu.dma_semaphore, #tpu.memory_space<semaphore_mem>>
    tpu.wait_dma2 semaphore(%92 : memref<!tpu.dma_semaphore, #tpu.memory_space<semaphore_mem>>) src(%89 : memref<1x1x128xf32, #tpu.memory_space<any>>) dst(%90 : memref<1x1x128xf32, #tpu.memory_space<vmem>>)
    %c4_i32_89 = arith.constant 4 : i32
    %c0_i32_90 = arith.constant 0 : i32
    %c0_i32_91 = arith.constant 0 : i32
    %93 = tpu.memref_slice %arg2[%arg0, %c0_i32_90, %c0_i32_91] : memref<2x17x128xf32, #tpu.memory_space<any>> -> memref<1x1x128xf32, #tpu.memory_space<any>>
    %c0_i32_92 = arith.constant 0 : i32
    %c0_i32_93 = arith.constant 0 : i32
    %c0_i32_94 = arith.constant 0 : i32
    %94 = tpu.memref_slice %arg3[%c0_i32_92, %c0_i32_93, %c0_i32_94] : memref<1x9x128xf32, #tpu.memory_space<vmem>> -> memref<1x1x128xf32, #tpu.memory_space<vmem>>
    %95 = tpu.memref_slice %arg4[%c4_i32_89] : memref<9x!tpu.dma_semaphore, #tpu.memory_space<semaphore_mem>> -> memref<1x!tpu.dma_semaphore, #tpu.memory_space<semaphore_mem>>
    %96 = tpu.memref_squeeze %95 : memref<1x!tpu.dma_semaphore, #tpu.memory_space<semaphore_mem>> -> memref<!tpu.dma_semaphore, #tpu.memory_space<semaphore_mem>>
    tpu.wait_dma2 semaphore(%96 : memref<!tpu.dma_semaphore, #tpu.memory_space<semaphore_mem>>) src(%93 : memref<1x1x128xf32, #tpu.memory_space<any>>) dst(%94 : memref<1x1x128xf32, #tpu.memory_space<vmem>>)
    %c5_i32_95 = arith.constant 5 : i32
    %c0_i32_96 = arith.constant 0 : i32
    %c0_i32_97 = arith.constant 0 : i32
    %97 = tpu.memref_slice %arg2[%arg0, %c0_i32_96, %c0_i32_97] : memref<2x17x128xf32, #tpu.memory_space<any>> -> memref<1x1x128xf32, #tpu.memory_space<any>>
    %c0_i32_98 = arith.constant 0 : i32
    %c0_i32_99 = arith.constant 0 : i32
    %c0_i32_100 = arith.constant 0 : i32
    %98 = tpu.memref_slice %arg3[%c0_i32_98, %c0_i32_99, %c0_i32_100] : memref<1x9x128xf32, #tpu.memory_space<vmem>> -> memref<1x1x128xf32, #tpu.memory_space<vmem>>
    %99 = tpu.memref_slice %arg4[%c5_i32_95] : memref<9x!tpu.dma_semaphore, #tpu.memory_space<semaphore_mem>> -> memref<1x!tpu.dma_semaphore, #tpu.memory_space<semaphore_mem>>
    %100 = tpu.memref_squeeze %99 : memref<1x!tpu.dma_semaphore, #tpu.memory_space<semaphore_mem>> -> memref<!tpu.dma_semaphore, #tpu.memory_space<semaphore_mem>>
    tpu.wait_dma2 semaphore(%100 : memref<!tpu.dma_semaphore, #tpu.memory_space<semaphore_mem>>) src(%97 : memref<1x1x128xf32, #tpu.memory_space<any>>) dst(%98 : memref<1x1x128xf32, #tpu.memory_space<vmem>>)
    %c6_i32_101 = arith.constant 6 : i32
    %c0_i32_102 = arith.constant 0 : i32
    %c0_i32_103 = arith.constant 0 : i32
    %101 = tpu.memref_slice %arg2[%arg0, %c0_i32_102, %c0_i32_103] : memref<2x17x128xf32, #tpu.memory_space<any>> -> memref<1x1x128xf32, #tpu.memory_space<any>>
    %c0_i32_104 = arith.constant 0 : i32
    %c0_i32_105 = arith.constant 0 : i32
    %c0_i32_106 = arith.constant 0 : i32
    %102 = tpu.memref_slice %arg3[%c0_i32_104, %c0_i32_105, %c0_i32_106] : memref<1x9x128xf32, #tpu.memory_space<vmem>> -> memref<1x1x128xf32, #tpu.memory_space<vmem>>
    %103 = tpu.memref_slice %arg4[%c6_i32_101] : memref<9x!tpu.dma_semaphore, #tpu.memory_space<semaphore_mem>> -> memref<1x!tpu.dma_semaphore, #tpu.memory_space<semaphore_mem>>
    %104 = tpu.memref_squeeze %103 : memref<1x!tpu.dma_semaphore, #tpu.memory_space<semaphore_mem>> -> memref<!tpu.dma_semaphore, #tpu.memory_space<semaphore_mem>>
    tpu.wait_dma2 semaphore(%104 : memref<!tpu.dma_semaphore, #tpu.memory_space<semaphore_mem>>) src(%101 : memref<1x1x128xf32, #tpu.memory_space<any>>) dst(%102 : memref<1x1x128xf32, #tpu.memory_space<vmem>>)
    %c7_i32_107 = arith.constant 7 : i32
    %c0_i32_108 = arith.constant 0 : i32
    %c0_i32_109 = arith.constant 0 : i32
    %105 = tpu.memref_slice %arg2[%arg0, %c0_i32_108, %c0_i32_109] : memref<2x17x128xf32, #tpu.memory_space<any>> -> memref<1x1x128xf32, #tpu.memory_space<any>>
    %c0_i32_110 = arith.constant 0 : i32
    %c0_i32_111 = arith.constant 0 : i32
    %c0_i32_112 = arith.constant 0 : i32
    %106 = tpu.memref_slice %arg3[%c0_i32_110, %c0_i32_111, %c0_i32_112] : memref<1x9x128xf32, #tpu.memory_space<vmem>> -> memref<1x1x128xf32, #tpu.memory_space<vmem>>
    %107 = tpu.memref_slice %arg4[%c7_i32_107] : memref<9x!tpu.dma_semaphore, #tpu.memory_space<semaphore_mem>> -> memref<1x!tpu.dma_semaphore, #tpu.memory_space<semaphore_mem>>
    %108 = tpu.memref_squeeze %107 : memref<1x!tpu.dma_semaphore, #tpu.memory_space<semaphore_mem>> -> memref<!tpu.dma_semaphore, #tpu.memory_space<semaphore_mem>>
    tpu.wait_dma2 semaphore(%108 : memref<!tpu.dma_semaphore, #tpu.memory_space<semaphore_mem>>) src(%105 : memref<1x1x128xf32, #tpu.memory_space<any>>) dst(%106 : memref<1x1x128xf32, #tpu.memory_space<vmem>>)
    %c8_i32_113 = arith.constant 8 : i32
    %c0_i32_114 = arith.constant 0 : i32
    %c0_i32_115 = arith.constant 0 : i32
    %109 = tpu.memref_slice %arg2[%arg0, %c0_i32_114, %c0_i32_115] : memref<2x17x128xf32, #tpu.memory_space<any>> -> memref<1x1x128xf32, #tpu.memory_space<any>>
    %c0_i32_116 = arith.constant 0 : i32
    %c0_i32_117 = arith.constant 0 : i32
    %c0_i32_118 = arith.constant 0 : i32
    %110 = tpu.memref_slice %arg3[%c0_i32_116, %c0_i32_117, %c0_i32_118] : memref<1x9x128xf32, #tpu.memory_space<vmem>> -> memref<1x1x128xf32, #tpu.memory_space<vmem>>
    %111 = tpu.memref_slice %arg4[%c8_i32_113] : memref<9x!tpu.dma_semaphore, #tpu.memory_space<semaphore_mem>> -> memref<1x!tpu.dma_semaphore, #tpu.memory_space<semaphore_mem>>
    %112 = tpu.memref_squeeze %111 : memref<1x!tpu.dma_semaphore, #tpu.memory_space<semaphore_mem>> -> memref<!tpu.dma_semaphore, #tpu.memory_space<semaphore_mem>>
    tpu.wait_dma2 semaphore(%112 : memref<!tpu.dma_semaphore, #tpu.memory_space<semaphore_mem>>) src(%109 : memref<1x1x128xf32, #tpu.memory_space<any>>) dst(%110 : memref<1x1x128xf32, #tpu.memory_space<vmem>>)
    return
  }
  func.func @transform_1(%arg0: i32, %arg1: memref<16xi32, #tpu.memory_space<smem>>) -> (i32, i32, i32) {
    %c0_i32 = arith.constant 0 : i32
    %c0_i32_0 = arith.constant 0 : i32
    %c0_i32_1 = arith.constant 0 : i32
    return %arg0, %c0_i32, %c0_i32_0 : i32, i32, i32
  }
}

</mosaic_0001>

<bundles_post_ra>
// kernel: tpu_custom_call.1
= control target key start
LH: loop header
LB: loop body
LE: loop exit
PB: predicated region body
PF: predicated region fallthrough
CT: control target
= control target key end

     0   :  { %s964_s0 = inlined_call_operand.vmem [shape: s32[16], index: 0, kind: input, shape index: {}]   ;;  %s965_s1 = inlined_call_operand.vmem [shape: f32[2,17,128], index: 1, kind: input, shape index: {}]   ;;  %s966_s2 = inlined_call_operand.vmem [shape: f32[2,9,128], index: 2, kind: output, shape index: {}]  }
   0x1   :  { %s7_s11 = sshll.u32 %s964_s0, 4  ;;  %s8_s11 = int_to_ptr.vmem [resolvable:$true] %s7_s11 }
   0x2   :  { %s830_s12 = scalar_lea.vmem %s8_s11, 16  ;;  %p835_p1 = scmp.lt.s32.totalorder %s8_s11, %s8_s11 }
   0x3   :  { %p831_p0 = scmp.ne.s32.totalorder %s8_s11, %s830_s12  ;;  %p836_p2 = scmp.lt.s32.totalorder %s830_s12, %s830_s12 }
   0x5   :  { %p837_p3 = por %p836_p2, %p835_p1 }
   0x7   :  { %p838_p4 = pnand %p837_p3, %p831_p0 }
   0x9   :  { %841 = shalt.err (!%p838_p4)  }
   0xa   :  { %s870_s13 = smov [#allocation4]  }
   0xb   :  { %10 = dma.vmem_to_smem %s8_s11, 16, %s870_s13, [#allocation3] }
   0xc   :  { %846 = dma.done.wait [#allocation3], 16 }
   0xd   :  { %847 = vsyncadd [#allocation3], 4294967280 }
   0xe   :  { %12 = sfence }
   0xf   :  { %s889_s14 = smov 0  }
  0x10 LB: > { %p773_p5 = scmp.ge.s32.totalorder %s868_s14, 2  ;;  %s868_s14 = sphi %s889_s14, %s18_s14  }
  0x11   : > { %p51_p6 = scmp.lt.s32.totalorder (!%p773_p5), %s868_s14, 1  ;;  %s897_s0 = smul.u32 (!%p773_p5), 24, %s868_s14 }
  0x12   : > { %43 = sbr.rel (%p773_p5) target bundleno = 137 (0x89), region = 12 }
  0x13   : > { %s57_s18 = scalar_lea.vmem (!%p773_p5), %s965_s1, %s897_s0 }
  0x14   : > { %v76_v0 = vld [vmem:[%s57_s18] sm:$0x1] (!%p773_p5) }
  0x19   : > { %s52_s15 = scalar_select %p51_p6, %s868_s14, 1 }
  0x1b   : > { %s820_s19 = sshll.u32 %s52_s15, 4 }
  0x1c   : > { %s907_s22 = scalar_lea.vmem %s966_s2, %s820_s19 }
  0x1d   : > { %77 = vst [vmem:[%s907_s22] sm:$0x1] %v76_v0 }
  0x1e   : > { %102 = vsyncadd [#allocation2 + $0x8], 16  ;;  %s911_s23 = sshll.u32 %s868_s14, 3 }
  0x1f   : > { %s104_s24 = sld [smem:[#allocation4 + %s911_s23]] }
  0x25   : > { %s622_s25 = sadd.s32 %s104_s24, %s897_s0 }
  0x26   : > { %s623_s28 = scalar_lea.vmem %s965_s1, %s622_s25 }
  0x27   : > { %v779_v1 = vld [vmem:[%s623_s28 + $0x1] sm:$0x1] }
  0x28   : > { %780 = vst [vmem:[%s907_s22 + $0x1] sm:$0x1] %v779_v1 }
  0x29   : > { %152 = vsyncadd [#allocation2], 16  ;;  %s153_s29 = sadd.s32 1, %s911_s23 }
  0x2a   : > { %s154_s30 = sld [smem:[#allocation4 + %s153_s29]] }
  0x30   : > { %s630_s3 = sadd.s32 %s154_s30, %s897_s0 }
  0x31   : > { %s631_s6 = scalar_lea.vmem %s965_s1, %s630_s3 }
  0x32   : > { %v783_v2 = vld [vmem:[%s631_s6 + $0x1] sm:$0x1] }
  0x33   : > { %784 = vst [vmem:[%s907_s22 + $0x2] sm:$0x1] %v783_v2 }
  0x34   : > { %203 = vsyncadd [#allocation2 + $0x1], 16  ;;  %s204_s7 = sadd.s32 2, %s911_s23 }
  0x35   : > { %s205_s8 = sld [smem:[#allocation4 + %s204_s7]] }
  0x3b   : > { %s638_s9 = sadd.s32 %s205_s8, %s897_s0 }
  0x3c   : > { %s639_s12 = scalar_lea.vmem %s965_s1, %s638_s9 }
  0x3d   : > { %v787_v3 = vld [vmem:[%s639_s12 + $0x1] sm:$0x1] }
  0x3e   : > { %788 = vst [vmem:[%s907_s22 + $0x3] sm:$0x1] %v787_v3 }
  0x3f   : > { %254 = vsyncadd [#allocation2 + $0x2], 16  ;;  %s255_s13 = sadd.s32 3, %s911_s23 }
  0x40   : > { %s256_s15 = sld [smem:[#allocation4 + %s255_s13]] }
  0x46   : > { %s646_s16 = sadd.s32 %s256_s15, %s897_s0 }
  0x47   : > { %s647_s19 = scalar_lea.vmem %s965_s1, %s646_s16 }
  0x48   : > { %v791_v4 = vld [vmem:[%s647_s19 + $0x1] sm:$0x1] }
  0x49   : > { %792 = vst [vmem:[%s907_s22 + $0x4] sm:$0x1] %v791_v4 }
  0x4a   : > { %305 = vsyncadd [#allocation2 + $0x3], 16  ;;  %s306_s20 = sadd.s32 4, %s911_s23 }
  0x4b   : > { %s307_s21 = sld [smem:[#allocation4 + %s306_s20]] }
  0x51   : > { %s654_s24 = sadd.s32 %s307_s21, %s897_s0 }
  0x52   : > { %s655_s27 = scalar_lea.vmem %s965_s1, %s654_s24 }
  0x53   : > { %v795_v5 = vld [vmem:[%s655_s27 + $0x1] sm:$0x1] }
  0x54   : > { %796 = vst [vmem:[%s907_s22 + $0x5] sm:$0x1] %v795_v5 }
  0x55   : > { %356 = vsyncadd [#allocation2 + $0x4], 16  ;;  %s357_s28 = sadd.s32 5, %s911_s23 }
  0x56   : > { %s358_s29 = sld [smem:[#allocation4 + %s357_s28]] }
  0x5c   : > { %s662_s30 = sadd.s32 %s358_s29, %s897_s0 }
  0x5d   : > { %s663_s5 = scalar_lea.vmem %s965_s1, %s662_s30 }
  0x5e   : > { %v799_v6 = vld [vmem:[%s663_s5 + $0x1] sm:$0x1] }
  0x5f   : > { %800 = vst [vmem:[%s907_s22 + $0x6] sm:$0x1] %v799_v6 }
  0x60   : > { %407 = vsyncadd [#allocation2 + $0x5], 16  ;;  %s408_s6 = sadd.s32 6, %s911_s23 }
  0x61   : > { %s409_s7 = sld [smem:[#allocation4 + %s408_s6]] }
  0x67   : > { %s670_s8 = sadd.s32 %s409_s7, %s897_s0 }
  0x68   : > { %s671_s11 = scalar_lea.vmem %s965_s1, %s670_s8 }
  0x69   : > { %v803_v7 = vld [vmem:[%s671_s11 + $0x1] sm:$0x1] }
  0x6a   : > { %804 = vst [vmem:[%s907_s22 + $0x7] sm:$0x1] %v803_v7 }
  0x6b   : > { %458 = vsyncadd [#allocation2 + $0x6], 16  ;;  %s459_s12 = sadd.s32 7, %s911_s23 }
  0x6c   : > { %s460_s13 = sld [smem:[#allocation4 + %s459_s12]] }
  0x72   : > { %s678_s15 = sadd.s32 %s460_s13, %s897_s0 }
  0x73   : > { %s679_s18 = scalar_lea.vmem %s965_s1, %s678_s15 }
  0x74   : > { %v807_v8 = vld [vmem:[%s679_s18 + $0x1] sm:$0x1] }
  0x75   : > { %808 = vst [vmem:[%s907_s22 + $0x8] sm:$0x1] %v807_v8 }
  0x76   : > { %509 = vsyncadd [#allocation2 + $0x7], 16 }
  0x77   : > { %848 = dma.done.wait [#allocation2], 16 }
  0x78   : > { %849 = vsyncadd [#allocation2], 4294967280 }
  0x79   : > { %850 = dma.done.wait [#allocation2 + $0x1], 16 }
  0x7a   : > { %851 = vsyncadd [#allocation2 + $0x1], 4294967280 }
  0x7b   : > { %852 = dma.done.wait [#allocation2 + $0x2], 16 }
  0x7c   : > { %853 = vsyncadd [#allocation2 + $0x2], 4294967280 }
  0x7d   : > { %854 = dma.done.wait [#allocation2 + $0x3], 16 }
  0x7e   : > { %855 = vsyncadd [#allocation2 + $0x3], 4294967280 }
  0x7f   : > { %856 = dma.done.wait [#allocation2 + $0x4], 16 }
  0x80   : > { %857 = vsyncadd [#allocation2 + $0x4], 4294967280 }
  0x81   : > { %858 = dma.done.wait [#allocation2 + $0x5], 16 }
  0x82   : > { %859 = vsyncadd [#allocation2 + $0x5], 4294967280 }
  0x83   : > { %860 = dma.done.wait [#allocation2 + $0x6], 16 }
  0x84   : > { %861 = vsyncadd [#allocation2 + $0x6], 4294967280 }
  0x85   : > { %862 = dma.done.wait [#allocation2 + $0x7], 16 }
  0x86   : > { %863 = vsyncadd [#allocation2 + $0x7], 4294967280 }
  0x87   : > { %864 = dma.done.wait [#allocation2 + $0x8], 16 }
  0x88   : > { %865 = vsyncadd [#allocation2 + $0x8], 4294967280 }
  0x89 PF: > { %s18_s14 = sadd.s32 1, %s868_s14  }
  0x8a   : > { %p15_p7 = scmp.ge.s32.totalorder %s18_s14, 3  }
  0x8c   :  { %17 = sbr.rel (!%p15_p7) target bundleno = 16 (0x10), region = 432 }
  0x93   :  { %551 = vsyncmov [#allocation2] }
  0x96   :  { %s552_s0 = vpop.sfrf %551 }
  0x97   :  { %p811_p8 = scmp.ne.s32.totalorder %s552_s0, 0 }
  0x99   :  { %556 = shalt.err (%p811_p8)  }
  0x9a   :  { %558 = vsyncmov [#allocation2 + $0x1] }
  0x9d   :  { %s559_s22 = vpop.sfrf %558 }
  0x9e   :  { %p812_p9 = scmp.ne.s32.totalorder %s559_s22, 0 }
  0xa0   :  { %563 = shalt.err (%p812_p9)  }
  0xa1   :  { %565 = vsyncmov [#allocation2 + $0x2] }
  0xa4   :  { %s566_s23 = vpop.sfrf %565 }
  0xa5   :  { %p813_p10 = scmp.ne.s32.totalorder %s566_s23, 0 }
  0xa7   :  { %570 = shalt.err (%p813_p10)  }
  0xa8   :  { %572 = vsyncmov [#allocation2 + $0x3] }
  0xab   :  { %s573_s19 = vpop.sfrf %572 }
  0xac   :  { %p814_p11 = scmp.ne.s32.totalorder %s573_s19, 0 }
  0xae   :  { %577 = shalt.err (%p814_p11)  }
  0xaf   :  { %579 = vsyncmov [#allocation2 + $0x4] }
  0xb2   :  { %s580_s20 = vpop.sfrf %579 }
  0xb3   :  { %p815_p12 = scmp.ne.s32.totalorder %s580_s20, 0 }
  0xb5   :  { %584 = shalt.err (%p815_p12)  }
  0xb6   :  { %586 = vsyncmov [#allocation2 + $0x5] }
  0xb9   :  { %s587_s1 = vpop.sfrf %586 }
  0xba   :  { %p816_p13 = scmp.ne.s32.totalorder %s587_s1, 0 }
  0xbc   :  { %591 = shalt.err (%p816_p13)  }
  0xbd   :  { %593 = vsyncmov [#allocation2 + $0x6] }
  0xc0   :  { %s594_s2 = vpop.sfrf %593 }
  0xc1   :  { %p817_p0 = scmp.ne.s32.totalorder %s594_s2, 0 }
  0xc3   :  { %598 = shalt.err (%p817_p0)  }
  0xc4   :  { %600 = vsyncmov [#allocation2 + $0x7] }
  0xc7   :  { %s601_s14 = vpop.sfrf %600 }
  0xc8   :  { %p818_p1 = scmp.ne.s32.totalorder %s601_s14, 0 }
  0xca   :  { %605 = shalt.err (%p818_p1)  }
  0xcb   :  { %607 = vsyncmov [#allocation2 + $0x8] }
  0xce   :  { %s608_s21 = vpop.sfrf %607 }
  0xcf   :  { %p819_p2 = scmp.ne.s32.totalorder %s608_s21, 0 }
  0xd1   :  { %612 = shalt.err (%p819_p2)  }

</bundles_post_ra>
